<compile_context>
chip_gen: v6e
topology: v6e:2x2x1
jax: 0.10.0
libtpu: 0.0.40
codegen_flags: <defaults>
</compile_context>

<pallas_src>
import functools

import jax
import jax.numpy as jnp
from jax.experimental import pallas as pl
from jax.experimental.pallas import tpu as pltpu

_TARGET_X_TILE_BYTES = 4 << 20  # ~4 MiB x tile; x2 (double buffer) + mask << VMEM limit


def _masked_avg_pool_kernel(x_ref, mask_ref, o_ref, *, eps):
    # x_ref:    (Bb, Ft, T)  input block
    # mask_ref: (Bb, 1,  T)  int8 mask block (1 keep / 0 drop), broadcast over features
    # o_ref:    (Bb, Ft)     squeezed output block (features on the lane axis)
    x = x_ref[...].astype(jnp.float32)
    m = mask_ref[...].astype(jnp.float32)           # in-kernel cast: free in a DMA-bound kernel
    sums = jnp.sum(x * m, axis=-1)                  # (Bb, Ft), f32 accumulation
    cnt = jnp.sum(m, axis=-1) + eps                 # (Bb, 1),  f32 count (+ eps)
    inv = pl.reciprocal(cnt)                        # exact; one per batch row, EUP side
    o_ref[...] = (sums * inv).astype(o_ref.dtype)


def _pick_tiles(B, F, T, itemsize, target_bytes=_TARGET_X_TILE_BYTES):
    """Choose (batch_block, feature_block) so the x tile is ~target_bytes."""
    per_row = max(1, F * T * itemsize)              # bytes of one batch row's (F, T) slab
    if per_row <= target_bytes:
        ft = F
        bb = min(B, max(1, target_bytes // per_row))
        if bb >= B and B >= 16:
            bb = (B + 1) // 2                       # >= 2 grid steps -> both v7x TCs get work
        return int(bb), int(ft)
    # A single (F, T) row exceeds the target: tile the feature axis too.
    # The feature block is the output lane dim -> multiple of 128 (or all of F).
    ft = (target_bytes // max(1, T * itemsize)) // 128 * 128
    ft = min(max(128, ft), F)
    return 1, int(ft)


def masked_avg_pool_1d(x, mask, *, eps=1e-5):
    """x: (B, F, T) float; mask: (B, T) bool / 0-1.  Returns (B, F, 1)."""
    B, F, T = x.shape
    itemsize = jnp.dtype(x.dtype).itemsize
    bb, ft = _pick_tiles(B, F, T, itemsize)
    grid = (pl.cdiv(B, bb), pl.cdiv(F, ft))

    # Mask goes in as int8: no f32 mask pass over HBM in the wrapper, 4x smaller DMA.
    mask_i8 = mask.astype(jnp.int8).reshape(B, 1, T)

    kernel = functools.partial(_masked_avg_pool_kernel, eps=eps)

    out = pl.pallas_call(
        kernel,
        # Lane-dense output: (B, 1, F) with F on the lane axis; reshaped below (free).
        out_shape=jax.ShapeDtypeStruct((B, 1, F), x.dtype),
        grid_spec=pltpu.PrefetchScalarGridSpec(
            num_scalar_prefetch=0,
            grid=grid,
            in_specs=[
                pl.BlockSpec((bb, ft, T), lambda b, f: (b, f, 0)),
                pl.BlockSpec((bb, 1, T), lambda b, f: (b, 0, 0)),
            ],
            # Middle unit dim squeezed out of the kernel ref -> o_ref is (bb, ft).
            out_specs=pl.BlockSpec((bb, None, ft), lambda b, f: (b, 0, f)),
        ),
        compiler_params=pltpu.CompilerParams(
            dimension_semantics=("parallel", "parallel"),
            # Above v5e's 16 MiB / v6e's 32 MiB scoped defaults, safely below v7x's
            # 64 MiB physical VMEM; actual use with ~4 MiB tiles is ~10 MiB.
            vmem_limit_bytes=48 << 20,
        ),
    )(x, mask_i8)

    # (B, 1, F) -> (B, F, 1): identical row-major order, pure metadata reshape.
    return out.reshape(B, F, 1)


if __name__ == "__main__":
    B, F, T = 2, 4, 16
    key = jax.random.PRNGKey(0)
    kx, km = jax.random.split(key)
    x = jax.random.normal(kx, (B, F, T), dtype=jnp.float32)
    mask = jax.random.bernoulli(km, p=0.6, shape=(B, T))

    out = masked_avg_pool_1d(x, mask)
    out = jax.block_until_ready(out)

    # Reference check (pure JAX, mirrors the PyTorch module).
    m = mask.astype(x.dtype)[:, None, :]
    ref = (x * m).sum(-1, keepdims=True) / (m.sum(-1, keepdims=True) + 1e-5)
    assert out.shape == (B, F, 1)
    assert jnp.allclose(out, ref, atol=1e-5, rtol=1e-5)

    print("KERNEL_OK")
</pallas_src>

<mosaic_0001>
module attributes {stable_mosaic.version = 11 : i64} {
  func.func @_masked_avg_pool_kernel(%arg0: i32, %arg1: i32, %arg2: memref<2x4x16xf32, #tpu.memory_space<vmem>>, %arg3: memref<2x1x16xi8, #tpu.memory_space<vmem>>, %arg4: memref<2x1x4xf32, #tpu.memory_space<vmem>>) attributes {dimension_semantics = [#tpu.dimension_semantics<parallel>, #tpu.dimension_semantics<parallel>], iteration_bounds = array<i64: 1, 1>, scalar_prefetch = 0 : i64, scratch_operands = 0 : i64, tpu.core_type = #tpu.core_type<tc>, window_params = [{transform_indices = @transform_0, window_bounds = array<i64: 2, 4, 16>}, {transform_indices = @transform_1, window_bounds = array<i64: 2, 1, 16>}, {transform_indices = @transform_2, window_bounds = array<i64: 2, 1, 4>}]} {
    %c0 = arith.constant 0 : index
    %c0_0 = arith.constant 0 : index
    %c0_1 = arith.constant 0 : index
    %0 = vector.load %arg2[%c0, %c0_0, %c0_1] : memref<2x4x16xf32, #tpu.memory_space<vmem>>, vector<2x4x16xf32>
    %c0_2 = arith.constant 0 : index
    %c0_3 = arith.constant 0 : index
    %c0_4 = arith.constant 0 : index
    %1 = vector.load %arg3[%c0_2, %c0_3, %c0_4] : memref<2x1x16xi8, #tpu.memory_space<vmem>>, vector<2x1x16xi8>
    %2 = arith.sitofp %1 : vector<2x1x16xi8> to vector<2x1x16xf32>
    %3 = vector.broadcast %2 : vector<2x1x16xf32> to vector<2x4x16xf32>
    %4 = arith.mulf %0, %3 : vector<2x4x16xf32>
    %cst = arith.constant dense<0.000000e+00> : vector<2x4xf32>
    %5 = vector.multi_reduction <add>, %4, %cst [2] : vector<2x4x16xf32> to vector<2x4xf32>
    %cst_5 = arith.constant dense<0.000000e+00> : vector<2x1xf32>
    %6 = vector.multi_reduction <add>, %2, %cst_5 [2] : vector<2x1x16xf32> to vector<2x1xf32>
    %cst_6 = arith.constant 9.99999974E-6 : f32
    %7 = vector.broadcast %cst_6 : f32 to vector<2x1xf32>
    %8 = arith.addf %6, %7 : vector<2x1xf32>
    %9 = tpu.reciprocal %8 : vector<2x1xf32> -> vector<2x1xf32>
    %10 = vector.broadcast %9 : vector<2x1xf32> to vector<2x4xf32>
    %11 = arith.mulf %5, %10 : vector<2x4xf32>
    %c0_7 = arith.constant 0 : index
    %c0_8 = arith.constant 0 : index
    %c0_9 = arith.constant 0 : index
    %12 = vector.load %arg4[%c0_7, %c0_8, %c0_9] : memref<2x1x4xf32, #tpu.memory_space<vmem>>, vector<2x1x4xf32>
    %13 = vector.shape_cast %12 : vector<2x1x4xf32> to vector<2x4xf32>
    %14 = vector.shape_cast %11 : vector<2x4xf32> to vector<2x1x4xf32>
    tpu.vector_store %arg4[%c0_7, %c0_8, %c0_9], %14 {strides = array<i32>} : memref<2x1x4xf32, #tpu.memory_space<vmem>>, vector<2x1x4xf32>,
    return
  }
  func.func @transform_0(%arg0: i32, %arg1: i32) -> (i32, i32, i32) {
    %c0_i32 = arith.constant 0 : i32
    %c0_i32_0 = arith.constant 0 : i32
    return %arg0, %arg1, %c0_i32 : i32, i32, i32
  }
  func.func @transform_1(%arg0: i32, %arg1: i32) -> (i32, i32, i32) {
    %c0_i32 = arith.constant 0 : i32
    %c0_i32_0 = arith.constant 0 : i32
    %c0_i32_1 = arith.constant 0 : i32
    return %arg0, %c0_i32, %c0_i32_0 : i32, i32, i32
  }
  func.func @transform_2(%arg0: i32, %arg1: i32) -> (i32, i32, i32) {
    %c0_i32 = arith.constant 0 : i32
    %c0_i32_0 = arith.constant 0 : i32
    return %arg0, %c0_i32, %arg1 : i32, i32, i32
  }
}

</mosaic_0001>

<bundles_post_ra>
// kernel: tpu_custom_call.1
= control target key start
LH: loop header
LB: loop body
LE: loop exit
PB: predicated region body
PF: predicated region fallthrough
CT: control target
= control target key end

     0   :  { %7 = vsyncpa [#allocation3], 0  ;;  %s193_s0 = inlined_call_operand.hbm [shape: f32[2,4,16], index: 0, kind: input, shape index: {}]   ;;  %s194_s1 = inlined_call_operand.vmem [shape: s8[2,1,16], index: 1, kind: input, shape index: {}]   ;;  %s195_s2 = inlined_call_operand.hbm [shape: f32[2,1,4], index: 2, kind: output, shape index: {}]  }
   0x1   :  { %8 = vsyncpa [#allocation4], 0  ;;  %s160_s9 = smov [#allocation2]  }
   0x2   :  { %s14_s10 = sshll.u32 %s160_s9, 4  ;;  %s15_s10 = int_to_ptr.vmem [resolvable:$true] %s14_s10 }
   0x3   :  { %s124_s11 = scalar_lea.vmem %s15_s10, 128  ;;  %p129_p1 = scmp.lt.s32.totalorder %s15_s10, %s15_s10 }
   0x4   :  { %p125_p0 = scmp.ne.s32.totalorder %s15_s10, %s124_s11  ;;  %p130_p2 = scmp.lt.s32.totalorder %s124_s11, %s124_s11 }
   0x6   :  { %p131_p3 = por %p130_p2, %p129_p1 }
   0x8   :  { %p132_p4 = pnand %p131_p3, %p125_p0 }
   0xa   :  { %135 = shalt.err (!%p132_p4)
}
   0xb   :  { %s161_s12 = smov 64   ;;  %s162_s13 = smov 4  }
   0xc   :  { %20 = dma.hbm_to_vmem [thread:$0]  %s193_s0, 128, %s15_s10, [#allocation3], %s161_s12, %s161_s12, %s162_s13  }
   0xd   :  { %156 = dma.done.wait [#allocation3], 128  }
   0xe   :  { %157 = vsyncadd [#allocation3], 4294967168  ;;  %v34_v0 = vlaneseq  ;;  %v28_v2 = vld [vmem:[%s194_s1] sm:$0x1]  ;;  %v29_v3 = vld [vmem:[%s194_s1 + $0x1] sm:$0x1] }
   0xf   :  { %v30_v4 = vunpack.c.0.s8 %v28_v2  ;;  %v31_v5 = vunpack.c.0.s8 %v29_v3  ;;  %vm51_vm0 = vcmask 122880   ;;  %v26_v9 = vld [vmem:[#allocation2] sm:$0xf]  ;;  %v27_v10 = vld [vmem:[#allocation2 + $0x4] sm:$0xf]  ;;  %vm44_vm1 = vcmask 125952  }
  0x10   :  { %v35_v1 = vshrl.u32 %v34_v0, 7  ;;  %v75_v19 = vand.u32 127, %v34_v0  ;;  %vm86_vm2 = vcmask 24576   ;;  %s163_s0 = smov [#allocation5]  }
  0x11   :  { %v32_v7 = vcvt.s32.f32 %v30_v4  ;;  %v33_v8 = vcvt.s32.f32 %v31_v5  ;;  %s94_s1 = sshll.u32 %s163_s0, 4  ;;  %s95_s1 = int_to_ptr.vmem [resolvable:$true] %s94_s1 }
  0x12   :  { %v36_v6 = vsub.s32 0, %v35_v1  ;;  %v78_v20 = vsub.s32 %v75_v19, %v35_v1  ;;  %s136_s20 = scalar_lea.vmem %s95_s1, 32  ;;  %p141_p6 = scmp.lt.s32.totalorder %s95_s1, %s95_s1 }
  0x13   :  { %v52_v11 = vsel %vm51_vm0, %v32_v7, 0.0  ;;  %v55_v14 = vsel %vm51_vm0, %v33_v8, 0.0  ;;  %p137_p5 = scmp.ne.s32.totalorder %s95_s1, %s136_s20  ;;  %p142_p7 = scmp.lt.s32.totalorder %s136_s20, %s136_s20 }
  0x14   :  { %v37_v12 = vrot.slane %v32_v7, %v36_v6  ;;  %v41_v13 = vrot.slane %v33_v8, %v36_v6  ;;  %53 = vadd.xlane.f32.xlu0 %v52_v11 }
  0x15   :  { %p143_p8 = por %p142_p7, %p141_p6 }
  0x16   :  { %v42_v15 = vmul.f32 %v37_v12, %v26_v9  ;;  %v43_v16 = vmul.f32 %v41_v13, %v27_v10 }
  0x17   :  { %p144_p9 = pnand %p143_p8, %p137_p5 }
  0x18   :  { %v45_v17 = vsel %vm44_vm1, %v42_v15, 0.0  ;;  %56 = vadd.xlane.f32.xlu0 %v55_v14  ;;  %v48_v18 = vsel %vm44_vm1, %v43_v16, 0.0 }
  0x19   :  { %46 = vadd.xlane.f32.xlu1 %v45_v17 }
  0x1d   :  { %49 = vadd.xlane.f32.xlu1 %v48_v18 }
  0x9d   :  { %v54_v21 = vpop.xlane.xlu0 %53 }
  0x9e   :  { %v58_v22 = vadd.f32 1e-05, %v54_v21 }
  0xa0   :  { %112 = vrcp.f32 %v58_v22 }
  0xa1   :  { %v57_v23 = vpop.xlane.xlu0 %56 }
  0xa2   :  { %v59_v24 = vadd.f32 1e-05, %v57_v23  ;;  %v47_v25 = vpop.xlane.xlu1 %46 }
  0xa4   :  { %114 = vrcp.f32 %v59_v24 }
  0xa6   :  { %v50_v30 = vpop.xlane.xlu1 %49 }
  0xad   :  { %v113_v26 = vpop.eup %112 }
  0xae   :  { %v65_v27 = vrot.slane %v113_v26, %v36_v6 }
  0xb0   :  { %v70_v28 = vmul.f32 %v65_v27, %v47_v25 }
  0xb1   :  { %v115_v29 = vpop.eup %114 }
  0xb2   :  { %v79_v31 = vrot.slane %v70_v28, %v78_v20  ;;  %v69_v32 = vrot.slane %v115_v29, %v36_v6 }
  0xb4   :  { %87 = vst.msk [vmem:[#allocation5] sm:$0x1] %vm86_vm2, %v79_v31  ;;  %v71_v33 = vmul.f32 %v69_v32, %v50_v30 }
  0xb6   :  { %v83_v34 = vrot.slane %v71_v33, %v78_v20 }
  0xb8   :  { %88 = vst.msk [vmem:[#allocation5 + $0x1] sm:$0x1] %vm86_vm2, %v83_v34 }
  0xb9   :  { %147 = shalt.err (!%p144_p9)
}
  0xba   :  { %s164_s21 = smov 16   ;;  %s165_s22 = smov 1  }
  0xbb   :  { %100 = dma.vmem_to_hbm [thread:$0]  %s95_s1, 32, %s195_s2, [#allocation4], %s164_s21, %s164_s21, %s165_s22  }
  0xbc   :  { %158 = dma.done.wait [#allocation4], 32  }
  0xbd   :  { %159 = vsyncadd [#allocation4], 4294967264 }
  0xbe   :  { %104 = vsyncpa [#allocation3], 1 }
  0xbf   :  { %105 = vsyncpa [#allocation4], 1 }

</bundles_post_ra>
